<compile_context>
chip_gen: v6e
topology: v6e:2x2x1
jax: 0.10.0
libtpu: 0.0.40
codegen_flags: <defaults>
</compile_context>

<pallas_src>
import functools

import jax
import jax.numpy as jnp
from jax.experimental import pallas as pl
from jax.experimental.pallas import tpu as pltpu

LANE = 128
NEG_INF = -1e30                      # finite mask value: exp underflows to exactly 0
_HIGHEST = jax.lax.Precision.HIGHEST


def _round_up(x, m):
    return (x + m - 1) // m * m


def _pick_tile(n):
    """tm == tk so padding never exceeds round_up(n, 128); prefer the largest tile in
    {512, 256, 128} that still gives >= 2 dst tiles (v7x megacore split)."""
    np128 = _round_up(n, LANE)
    for t in (512, 256, 128):
        if np128 % t == 0 and np128 // t >= 2:
            return t
    return np128                     # tiny graph (np128 == 128): single tile


# --------------------------------------------------------------------------------------
# Prologue: one fused matmul  h @ [ W^T | W^T a_src | W^T a_dst | 0 ... ]
#   -> z (bf16, lane-padded) and the two f32 attention-logit columns (8 bytes/node).
# --------------------------------------------------------------------------------------
def _project_kernel(h_ref, wf_ref, z_ref, e2_ref, *, out_dim):
    zf = jnp.dot(h_ref[...], wf_ref[...],
                 preferred_element_type=jnp.float32, precision=_HIGHEST)
    z_ref[...] = zf.astype(z_ref.dtype)               # bf16 feature stream
    e2_ref[...] = zf[:, out_dim:out_dim + 2]          # f32 (a_src.z, a_dst.z)


def _project(h_pad, wf_pad, *, tile, out_dim):
    np_, in_dim = h_pad.shape
    dp = wf_pad.shape[1]
    return pl.pallas_call(
        functools.partial(_project_kernel, out_dim=out_dim),
        out_shape=(jax.ShapeDtypeStruct((np_, dp), jnp.bfloat16),
                   jax.ShapeDtypeStruct((np_, 2), jnp.float32)),
        grid=(np_ // tile,),
        in_specs=[pl.BlockSpec((tile, in_dim), lambda i: (i, 0)),
                  pl.BlockSpec((in_dim, dp), lambda i: (0, 0))],
        out_specs=(pl.BlockSpec((tile, dp), lambda i: (i, 0)),
                   pl.BlockSpec((tile, 2), lambda i: (i, 0))),
        compiler_params=pltpu.CompilerParams(dimension_semantics=("parallel",)),
    )(h_pad, wf_pad)


# --------------------------------------------------------------------------------------
# Attention: masked online softmax over incoming edges + alpha @ z, flash-style.
# --------------------------------------------------------------------------------------
def _attn_kernel(counts_ref, e_src_ref, e_dst_ref, adj_ref, z_ref, out_ref,
                 m_sc, l_sc, acc_sc, *, tile, z_resident):
    i = pl.program_id(0)
    k = pl.program_id(1)
    nk = pl.num_programs(1)

    @pl.when(k == 0)
    def _():
        m_sc[...] = jnp.full_like(m_sc, NEG_INF)
        l_sc[...] = jnp.zeros_like(l_sc)
        acc_sc[...] = jnp.zeros_like(acc_sc)

    # Block-sparse skip: an all-masked [tm,tk] tile only adds exp(NEG_INF - m) == 0 mass
    # (or garbage that a later corr == 0 cancels), so skipping it is exact and cheaper.
    @pl.when(counts_ref[i * nk + k] > 0)
    def _():
        # e[dst, src] = leaky_relu(a_dst.z[dst] + a_src.z[src]), negative_slope = 0.01
        e = e_dst_ref[...] + e_src_ref[...]                # [TM,1] + [1,TK] -> [TM,TK]
        e = jnp.maximum(e, 0.01 * e)                       # leaky_relu, one VPU op
        e = jnp.where(adj_ref[...] != 0, e, NEG_INF)       # mask non-edges (int8 adjacency)

        m_prev = m_sc[...]
        m_new = jnp.maximum(m_prev, jnp.max(e, axis=1, keepdims=True))
        corr = jnp.exp(m_prev - m_new)
        p = jnp.exp(e - m_new)                             # exactly 0 on masked entries

        if z_resident:                                     # z held in VMEM for the whole sweep
            start = pl.multiple_of(k * tile, tile)
            z_blk = z_ref[pl.ds(start, tile), :]
        else:
            z_blk = z_ref[...]

        l_sc[...] = corr * l_sc[...] + jnp.sum(p, axis=1, keepdims=True)
        acc_sc[...] = corr * acc_sc[...] + jnp.dot(
            p.astype(jnp.bfloat16), z_blk, preferred_element_type=jnp.float32)
        m_sc[...] = m_new

    @pl.when(k == nk - 1)
    def _():
        # DGL precondition: every real node has >= 1 incoming edge => l >= 1.  The max()
        # guard turns rows with no edge at all (padding / isolated) into 0 instead of NaN.
        inv = pl.reciprocal(jnp.maximum(l_sc[...], 1e-30), approx=True)
        out_ref[...] = (acc_sc[...] * inv).astype(out_ref.dtype)


# --------------------------------------------------------------------------------------
# Wrapper
# --------------------------------------------------------------------------------------
def gat_layer_forward(h, w_fc, w_attn, adj):
    """h: [N, in_dim]; w_fc: [out_dim, in_dim]; w_attn: [1, 2*out_dim]; adj[dst, src]
    (int8 / bool preferred -- avoids an extra O(N^2) f32 pass)."""
    n, in_dim = h.shape
    out_dim = w_fc.shape[0]
    dp = _round_up(out_dim + 2, LANE)        # room for the 2 folded logit columns
    tile = _pick_tile(n)
    np_ = _round_up(n, tile)
    n_tiles = np_ // tile

    # ---- prologue inputs --------------------------------------------------------------
    hf = jnp.asarray(h, jnp.float32)
    h_pad = hf if n == np_ else jnp.zeros((np_, in_dim), jnp.float32).at[:n].set(hf)

    w_t = jnp.asarray(w_fc, jnp.float32).T                        # [in_dim, out_dim]
    a2 = jnp.asarray(w_attn, jnp.float32).reshape(2, out_dim)     # rows: a_src, a_dst
    we = jnp.dot(w_t, a2.T, precision=_HIGHEST)                   # [in_dim, 2] folded vectors
    wf_pad = jnp.zeros((in_dim, dp), jnp.float32)
    wf_pad = wf_pad.at[:, :out_dim].set(w_t)
    wf_pad = wf_pad.at[:, out_dim:out_dim + 2].set(we)

    z, e2 = _project(h_pad, wf_pad, tile=tile, out_dim=out_dim)   # bf16 [N,dp], f32 [N,2]
    e_src_row = e2[:, 0].reshape(1, np_)                          # lane-dense [1, N] row
    e_dst_col = e2[:, 1].reshape(np_, 1)                          # [N, 1] column

    # ---- adjacency (int8, pad only if needed) + per-tile edge counts ---------------------
    adj_i8 = adj if adj.dtype == jnp.int8 else (adj != 0).astype(jnp.int8)
    if n != np_:
        adj_i8 = jnp.zeros((np_, np_), jnp.int8).at[:n, :n].set(adj_i8)
    counts = jnp.sum(adj_i8.reshape(n_tiles, tile, n_tiles, tile),
                     axis=(1, 3), dtype=jnp.int32).reshape(-1)    # SMEM skip table

    # ---- VMEM budget: keep z resident across the src loop when it fits ------------------
    z_bytes = np_ * dp * 2                                        # bf16
    z_resident = 2 * z_bytes <= 12 * 1024 * 1024                  # conservative for v7x (64 MiB)
    z_buf = (2 * z_bytes) if z_resident else (2 * tile * dp * 2)
    est = (2 * tile * tile                 # int8 adjacency, double buffered
           + 4 * tile * 4                  # e_src row + e_dst col
           + z_buf
           + 2 * tile * dp * 4             # f32 output blocks
           + tile * dp * 4 + 2 * tile * 4)  # acc + m/l scratch
    vmem_limit = int(min(max(2 * est, 8 * 1024 * 1024), 32 * 1024 * 1024))

    if z_resident:
        z_spec = pl.BlockSpec((np_, dp), lambda i, k, c: (0, 0))   # loaded once, kept in VMEM
    else:
        z_spec = pl.BlockSpec((tile, dp), lambda i, k, c: (k, 0))  # fallback: tiled by src

    out_pad = pl.pallas_call(
        functools.partial(_attn_kernel, tile=tile, z_resident=z_resident),
        out_shape=jax.ShapeDtypeStruct((np_, dp), jnp.float32),
        grid_spec=pltpu.PrefetchScalarGridSpec(
            num_scalar_prefetch=1,
            grid=(n_tiles, n_tiles),
            in_specs=[
                pl.BlockSpec((1, tile), lambda i, k, c: (0, k)),    # e_src row tile
                pl.BlockSpec((tile, 1), lambda i, k, c: (i, 0)),    # e_dst column tile
                pl.BlockSpec((tile, tile), lambda i, k, c: (i, k)),  # int8 adjacency tile
                z_spec,
            ],
            out_specs=pl.BlockSpec((tile, dp), lambda i, k, c: (i, 0)),
            scratch_shapes=[
                pltpu.VMEM((tile, 1), jnp.float32),    # running max
                pltpu.VMEM((tile, 1), jnp.float32),    # running denom
                pltpu.VMEM((tile, dp), jnp.float32),   # output accumulator
            ]),
        compiler_params=pltpu.CompilerParams(
            dimension_semantics=("parallel", "arbitrary"),
            vmem_limit_bytes=vmem_limit),
    )(counts, e_src_row, e_dst_col, adj_i8, z)

    return out_pad[:n, :out_dim]


# --------------------------------------------------------------------------------------
# Reference / test harness
# --------------------------------------------------------------------------------------
def _xavier_normal(key, shape, gain):
    fan_out, fan_in = shape
    std = gain * (2.0 / (fan_in + fan_out)) ** 0.5
    return std * jax.random.normal(key, shape, dtype=jnp.float32)


def _reference(h, w_fc, w_attn, adj):
    z = jnp.dot(h, w_fc.T, precision=_HIGHEST)
    out_dim = z.shape[1]
    a_src = w_attn[0, :out_dim]
    a_dst = w_attn[0, out_dim:]
    e = jnp.dot(z, a_dst, precision=_HIGHEST)[:, None] + \
        jnp.dot(z, a_src, precision=_HIGHEST)[None, :]          # [dst, src]
    e = jnp.where(e > 0, e, 0.01 * e)
    e = jnp.where(adj != 0, e, -jnp.inf)
    alpha = jax.nn.softmax(e, axis=1)
    alpha = jnp.where(adj != 0, alpha, 0.0)
    return jnp.dot(alpha, z, precision=_HIGHEST)


def _make_graph(n, key=None, p=0.0, ring=True):
    """int8 adjacency [dst, src]; every node has a self loop (DGL reduce precondition)."""
    idx = jnp.arange(n)
    adj = jnp.zeros((n, n), jnp.bool_).at[idx, idx].set(True)
    if ring:
        adj = adj.at[idx, (idx - 1) % n].set(True)
    if key is not None and p > 0.0:
        adj = adj | (jax.random.uniform(key, (n, n)) < p)
    return adj.astype(jnp.int8)


def _max_rel_err(a, b):
    return float(jnp.max(jnp.abs(a - b)) / jnp.maximum(jnp.max(jnp.abs(b)), 1e-6))


if __name__ == "__main__":
    gain = 2.0 ** 0.5  # nn.init.calculate_gain('relu')
    key = jax.random.PRNGKey(0)
    k_h, k_fc, k_attn, k_g, k_h2 = jax.random.split(key, 5)

    # --- small case matching the module spec: N=8 nodes, in_dim=16, out_dim=32 ---
    n, in_dim, out_dim = 8, 16, 32
    h = jax.random.normal(k_h, (n, in_dim), dtype=jnp.float32)
    w_fc = _xavier_normal(k_fc, (out_dim, in_dim), gain)          # fc.weight
    w_attn = _xavier_normal(k_attn, (1, 2 * out_dim), gain)       # attn_fc.weight
    adj = _make_graph(n)

    out = jax.block_until_ready(gat_layer_forward(h, w_fc, w_attn, adj))
    ref = _reference(h, w_fc, w_attn, adj)
    assert out.shape == (n, out_dim)
    # bf16 feature/matmul path: compare with a normalized tolerance instead of 1e-4.
    assert _max_rel_err(out, ref) < 2e-2, "mismatch vs reference (N=8)"

    # --- larger case exercising the multi-tile flash path (grid 2x2) ---
    n2 = 200
    h2 = jax.random.normal(k_h2, (n2, in_dim), dtype=jnp.float32)
    adj2 = _make_graph(n2, key=k_g, p=0.05)
    out2 = jax.block_until_ready(gat_layer_forward(h2, w_fc, w_attn, adj2))
    ref2 = _reference(h2, w_fc, w_attn, adj2)
    assert out2.shape == (n2, out_dim)
    assert _max_rel_err(out2, ref2) < 2e-2, "mismatch vs reference (N=200)"

    # --- self-loop-only graph: exercises the empty-tile skip path ---
    adj3 = _make_graph(n2, ring=False)
    out3 = jax.block_until_ready(gat_layer_forward(h2, w_fc, w_attn, adj3))
    ref3 = _reference(h2, w_fc, w_attn, adj3)
    assert _max_rel_err(out3, ref3) < 2e-2, "mismatch vs reference (N=200, self loops)"

    print("KERNEL_OK")
</pallas_src>

<mosaic_0001>
module attributes {stable_mosaic.version = 11 : i64} {
  func.func @_project_kernel(%arg0: i32, %arg1: memref<128x16xf32, #tpu.memory_space<vmem>>, %arg2: memref<16x128xf32, #tpu.memory_space<vmem>>, %arg3: memref<128x128xbf16, #tpu.memory_space<vmem>>, %arg4: memref<128x2xf32, #tpu.memory_space<vmem>>) attributes {dimension_semantics = [#tpu.dimension_semantics<parallel>], iteration_bounds = array<i64: 1>, scalar_prefetch = 0 : i64, scratch_operands = 0 : i64, tpu.core_type = #tpu.core_type<tc>, window_params = [{transform_indices = @transform_0, window_bounds = array<i64: 128, 16>}, {pipeline_mode = #tpu.pipeline_mode<synchronous>, transform_indices = @transform_1, window_bounds = array<i64: 16, 128>}, {transform_indices = @transform_2, window_bounds = array<i64: 128, 128>}, {transform_indices = @transform_3, window_bounds = array<i64: 128, 2>}]} {
    %c0 = arith.constant 0 : index
    %c0_0 = arith.constant 0 : index
    %0 = vector.load %arg1[%c0, %c0_0] : memref<128x16xf32, #tpu.memory_space<vmem>>, vector<128x16xf32>
    %c0_1 = arith.constant 0 : index
    %c0_2 = arith.constant 0 : index
    %1 = vector.load %arg2[%c0_1, %c0_2] : memref<16x128xf32, #tpu.memory_space<vmem>>, vector<16x128xf32>
    %cst = arith.constant dense<0.000000e+00> : vector<128x128xf32>
    %2 = tpu.matmul %0, %1, %cst {dimension_numbers = #tpu.dot_dimension_numbers<[1], [0], [0], [1], [0, 0, 1, 1], [], []>, precision = #tpu.contract_precision<fp32>} : vector<128x16xf32>, vector<16x128xf32>, vector<128x128xf32> -> vector<128x128xf32>
    %3 = arith.truncf %2 : vector<128x128xf32> to vector<128x128xbf16>
    %c0_3 = arith.constant 0 : index
    %c0_4 = arith.constant 0 : index
    %4 = vector.load %arg3[%c0_3, %c0_4] : memref<128x128xbf16, #tpu.memory_space<vmem>>, vector<128x128xbf16>
    tpu.vector_store %arg3[%c0_3, %c0_4], %3 {strides = array<i32>} : memref<128x128xbf16, #tpu.memory_space<vmem>>, vector<128x128xbf16>,
    %5 = vector.extract_strided_slice %2 {offsets = [0, 32], sizes = [128, 2], strides = [1, 1]} : vector<128x128xf32> to vector<128x2xf32>
    %c0_5 = arith.constant 0 : index
    %c0_6 = arith.constant 0 : index
    %6 = vector.load %arg4[%c0_5, %c0_6] : memref<128x2xf32, #tpu.memory_space<vmem>>, vector<128x2xf32>
    tpu.vector_store %arg4[%c0_5, %c0_6], %5 {strides = array<i32>} : memref<128x2xf32, #tpu.memory_space<vmem>>, vector<128x2xf32>,
    return
  }
  func.func @transform_0(%arg0: i32) -> (i32, i32) {
    %c0_i32 = arith.constant 0 : i32
    %c0_i32_0 = arith.constant 0 : i32
    return %arg0, %c0_i32 : i32, i32
  }
  func.func @transform_1(%arg0: i32) -> (i32, i32) {
    %c0_i32 = arith.constant 0 : i32
    %c0_i32_0 = arith.constant 0 : i32
    %c0_i32_1 = arith.constant 0 : i32
    return %c0_i32, %c0_i32_0 : i32, i32
  }
  func.func @transform_2(%arg0: i32) -> (i32, i32) {
    %c0_i32 = arith.constant 0 : i32
    %c0_i32_0 = arith.constant 0 : i32
    return %arg0, %c0_i32 : i32, i32
  }
  func.func @transform_3(%arg0: i32) -> (i32, i32) {
    %c0_i32 = arith.constant 0 : i32
    %c0_i32_0 = arith.constant 0 : i32
    return %arg0, %c0_i32 : i32, i32
  }
}

</mosaic_0001>

<bundles_post_ra>
// kernel: tpu_custom_call.1
= control target key start
LH: loop header
LB: loop body
LE: loop exit
PB: predicated region body
PF: predicated region fallthrough
CT: control target
= control target key end

     0   :  { %vm32_vm0 = vcmask 130048   ;;  %s2316_s0 = inlined_call_operand.vmem [shape: f32[128,16], index: 0, kind: input, shape index: {}]   ;;  %s2317_s1 = inlined_call_operand.vmem [shape: f32[16,128], index: 1, kind: input, shape index: {}]   ;;  %s2318_s2 = inlined_call_operand.hbm [shape: bf16[128,128], index: 2, kind: output, shape index: {0}]   ;;  %s2319_s3 = inlined_call_operand.vmem [shape: f32[128,2], index: 3, kind: output, shape index: {1}]  }
   0x1   :  { %v31_v0 = vld [vmem:[%s2317_s1 + $0x8] sm:$0xff]  ;;  %v30_v1 = vld [vmem:[%s2317_s1] sm:$0xff]  ;;  %v16_v7 = vld [vmem:[%s2316_s0 + $0x10] sm:$0xff] }
   0x2   :  { %v14_v2 = vld [vmem:[%s2316_s0] sm:$0xff]  ;;  %v1780_v3 = vand.u32 4294901760, %v31_v0  ;;  %v1782_v4 = vand.u32 4294901760, %v30_v1  ;;  %v15_v6 = vld [vmem:[%s2316_s0 + $0x8] sm:$0xff]  ;;  %v17_v8 = vld [vmem:[%s2316_s0 + $0x18] sm:$0xff]  ;;  %v40_v11 = vsel %vm32_vm0, %v16_v7, 0 }
   0x3   :  { %v34_v5 = vsel %vm32_vm0, %v14_v2, 0  ;;  %v37_v10 = vsel %vm32_vm0, %v15_v6, 0  ;;  %v43_v12 = vsel %vm32_vm0, %v17_v8, 0  ;;  %v18_v13 = vld [vmem:[%s2316_s0 + $0x20] sm:$0xff]  ;;  %v19_v14 = vld [vmem:[%s2316_s0 + $0x28] sm:$0xff]  ;;  %v1812_v18 = vand.u32 4294901760, %v40_v11 }
   0x4   :  { %v1794_v9 = vand.u32 4294901760, %v34_v5  ;;  %1553 = vmatprep.subr.mxu0 %v1780_v3  ;;  %v338_v15 = vsub.f32 %v31_v0, %v1780_v3  ;;  %v1807_v16 = vand.u32 4294901760, %v37_v10  ;;  %v1810_v17 = vsub.f32 %v30_v1, %v1782_v4 }
   0x5   :  { %1554 = vmatpush3.msra.mxu0 %v1780_v3  ;;  %v1819_v20 = vand.u32 4294901760, %v43_v12  ;;  %v46_v21 = vsel %vm32_vm0, %v18_v13, 0  ;;  %v49_v22 = vsel %vm32_vm0, %v19_v14, 0  ;;  %v1833_v26 = vsub.f32 %v40_v11, %v1812_v18 }
   0x6   :  { %v1816_v19 = vsub.f32 %v34_v5, %v1794_v9  ;;  %1585 = vmatprep.mubr.f32.mxu1 %v1794_v9  ;;  %1555 = vmatprep.subr.mxu0 %v1782_v4  ;;  %v1824_v23 = vand.u32 4294901760, %v338_v15  ;;  %v1827_v24 = vsub.f32 %v37_v10, %v1807_v16  ;;  %v1830_v25 = vand.u32 4294901760, %v1810_v17 }
   0x7   :  { %1556 = vmatpush3.msra.mxu0 %v1782_v4  ;;  %v1838_v28 = vsub.f32 %v43_v12, %v1819_v20  ;;  %v1840_v29 = vand.u32 4294901760, %v46_v21  ;;  %v1842_v30 = vand.u32 4294901760, %v49_v22 }
   0x8   :  { %v150_v27 = vand.u32 4294901760, %v1816_v19 }
   0x9   :  { %9 = vsyncpa [#allocation3], 0  ;;  %v340_v31 = vsub.f32 %v338_v15, %v1824_v23  ;;  %v160_v32 = vand.u32 4294901760, %v1827_v24  ;;  %v347_v33 = vsub.f32 %v1810_v17, %v1830_v25  ;;  %1609 = vmatprep.subr.mxu0 %v338_v15  ;;  %v170_v34 = vand.u32 4294901760, %v1833_v26  ;;  %v20_v39 = vld [vmem:[%s2316_s0 + $0x30] sm:$0xff]  ;;  %v21_v40 = vld [vmem:[%s2316_s0 + $0x38] sm:$0xff] }
   0xa   :  { %v151_v35 = vsub.f32 %v1816_v19, %v150_v27  ;;  %v180_v36 = vand.u32 4294901760, %v1838_v28  ;;  %v1854_v37 = vsub.f32 %v46_v21, %v1840_v29  ;;  %v1857_v38 = vsub.f32 %v49_v22, %v1842_v30  ;;  %v22_v49 = vld [vmem:[%s2316_s0 + $0x40] sm:$0xff]  ;;  %v23_v50 = vld [vmem:[%s2316_s0 + $0x48] sm:$0xff]  ;;  %v24_v51 = vld [vmem:[%s2316_s0 + $0x50] sm:$0xff]  ;;  %s1748_s20 = smov [#allocation2]  }
   0xb   :  { %v341_v41 = vand.u32 4294901760, %v340_v31  ;;  %v161_v42 = vsub.f32 %v1827_v24, %v160_v32  ;;  %v348_v43 = vand.u32 4294901760, %v347_v33  ;;  %v171_v44 = vsub.f32 %v1833_v26, %v170_v34  ;;  %v25_v60 = vld [vmem:[%s2316_s0 + $0x58] sm:$0xff]  ;;  %v26_v1 = vld [vmem:[%s2316_s0 + $0x60] sm:$0xff]  ;;  %v27_v13 = vld [vmem:[%s2316_s0 + $0x68] sm:$0xff]  ;;  %s1351_s21 = sshll.u32 %s1748_s20, 4  ;;  %s1352_s21 = int_to_ptr.vmem [resolvable:$true] %s1351_s21 }
   0xc   :  { %v152_v45 = vand.u32 4294901760, %v151_v35  ;;  %v181_v46 = vsub.f32 %v1838_v28, %v180_v36  ;;  %v190_v47 = vand.u32 4294901760, %v1854_v37  ;;  %v200_v48 = vand.u32 4294901760, %v1857_v38  ;;  %s1725_s1 = scalar_lea.vmem %s1352_s21, 1024  ;;  %p1730_p1 = scmp.lt.s32.totalorder %s1352_s21, %s1352_s21 }
   0xd   :  { %1581 = vmatprep.subr.mxu1 %v341_v41  ;;  %v162_v52 = vand.u32 4294901760, %v161_v42  ;;  %v172_v53 = vand.u32 4294901760, %v171_v44  ;;  %v52_v54 = vsel %vm32_vm0, %v20_v39, 0  ;;  %v55_v55 = vsel %vm32_vm0, %v21_v40, 0  ;;  %p1726_p0 = scmp.ne.s32.totalorder %s1352_s21, %s1725_s1  ;;  %p1731_p2 = scmp.lt.s32.totalorder %s1725_s1, %s1725_s1 }
   0xe   :  { %1557 = vmatprep.mubr.f32.mxu0 %v152_v45  ;;  %1582 = vmatpush3.msra.mxu1 %v341_v41  ;;  %v182_v56 = vand.u32 4294901760, %v181_v46  ;;  %v191_v57 = vsub.f32 %v1854_v37, %v190_v47  ;;  %v201_v58 = vsub.f32 %v1857_v38, %v200_v48  ;;  %v1893_v59 = vand.u32 4294901760, %v52_v54 }
   0xf   :  { %1558 = vmatmul.mubr.f32.vlgmr.msra.gmra.mxu0 %v162_v52  ;;  %1583 = vmatprep.subr.mxu1 %v348_v43  ;;  %v1898_v61 = vand.u32 4294901760, %v55_v55  ;;  %v58_v62 = vsel %vm32_vm0, %v22_v49, 0  ;;  %v61_v63 = vsel %vm32_vm0, %v23_v50, 0  ;;  %v64_v0 = vsel %vm32_vm0, %v24_v51, 0  ;;  %v28_v50 = vld [vmem:[%s2316_s0 + $0x70] sm:$0xff]  ;;  %p1732_p3 = por %p1731_p2, %p1730_p1 }
  0x10   :  { %1584 = vmatpush3.msra.mxu1 %v348_v43  ;;  %1610 = vmatpush3.msra.mxu0 %v338_v15  ;;  %v192_v2 = vand.u32 4294901760, %v191_v57  ;;  %v202_v5 = vand.u32 4294901760, %v201_v58  ;;  %v1907_v6 = vsub.f32 %v52_v54, %v1893_v59  ;;  %v1909_v7 = vand.u32 4294901760, %v58_v62  ;;  %v29_v57 = vld [vmem:[%s2316_s0 + $0x78] sm:$0xff]  ;;  %s1747_s0 = smov 96  }
  0x11   :  { %1586 = vmatmul.mubr.f32.vlgmr.msra.gmra.mxu1 %v1807_v16  ;;  %1637 = vmatprep.subr.mxu1 %v1780_v3  ;;  %v1914_v8 = vsub.f32 %v55_v55, %v1898_v61  ;;  %v1916_v10 = vand.u32 4294901760, %v61_v63  ;;  %v1918_v11 = vand.u32 4294901760, %v64_v0  ;;  %v67_v12 = vsel %vm32_vm0, %v25_v60, 0  ;;  %p1733_p4 = pnand %p1732_p3, %p1726_p0 }
  0x12   :  { %1560 = vmatprep.mubr.f32.mxu0 %v172_v53  ;;  %1638 = vmatpush3.msra.mxu1 %v1780_v3  ;;  %v210_v14 = vand.u32 4294901760, %v1907_v6  ;;  %v1927_v15 = vsub.f32 %v58_v62, %v1909_v7  ;;  %v1929_v21 = vand.u32 4294901760, %v67_v12  ;;  %v70_v22 = vsel %vm32_vm0, %v26_v1, 0 }
  0x13   :  { %1561 = vmatmul.mubr.f32.gmra.mxu0 %v182_v56  ;;  %1588 = vmatprep.mubr.f32.mxu1 %v1812_v18  ;;  %v220_v31 = vand.u32 4294901760, %v1914_v8  ;;  %v1935_v33 = vsub.f32 %v61_v63, %v1916_v10  ;;  %v1938_v35 = vsub.f32 %v64_v0, %v1918_v11  ;;  %v1940_v39 = vand.u32 4294901760, %v70_v22 }
  0x14   :  { %1563 = vmatprep.mubr.f32.mxu0 %v192_v2  ;;  %v211_v40 = vsub.f32 %v1907_v6, %v210_v14  ;;  %v230_v41 = vand.u32 4294901760, %v1927_v15  ;;  %1611 = vmatprep.subr.mxu0 %v1810_v17  ;;  %v1948_v42 = vsub.f32 %v67_v12, %v1929_v21  ;;  %v73_v43 = vsel %vm32_vm0, %v27_v13, 0 }
  0x15   :  { %1589 = vmatmul.mubr.f32.gmra.mxu1 %v1819_v20  ;;  %v221_v44 = vsub.f32 %v1914_v8, %v220_v31  ;;  %v240_v45 = vand.u32 4294901760, %v1935_v33  ;;  %1612 = vmatpush3.msra.mxu0 %v1810_v17  ;;  %v250_v46 = vand.u32 4294901760, %v1938_v35  ;;  %v1959_v49 = vsub.f32 %v70_v22, %v1940_v39 }
  0x16   :  { %1591 = vmatprep.mubr.f32.mxu1 %v1840_v29  ;;  %v212_v51 = vand.u32 4294901760, %v211_v40  ;;  %v231_v52 = vsub.f32 %v1927_v15, %v230_v41  ;;  %1639 = vmatprep.subr.mxu1 %v1782_v4  ;;  %v260_v17 = vand.u32 4294901760, %v1948_v42  ;;  %v1970_v53 = vand.u32 4294901760, %v73_v43 }
  0x17   :  { %1564 = vmatmul.mubr.f32.gmra.mxu0 %v202_v5  ;;  %v222_v54 = vand.u32 4294901760, %v221_v44  ;;  %v241_v55 = vsub.f32 %v1935_v33, %v240_v45  ;;  %v251_v56 = vsub.f32 %v1938_v35, %v250_v46  ;;  %1640 = vmatpush3.msra.mxu1 %v1782_v4  ;;  %v270_v60 = vand.u32 4294901760, %v1959_v49 }
  0x18   :  { %1566 = vmatprep.mubr.f32.mxu0 %v212_v51  ;;  %v232_v58 = vand.u32 4294901760, %v231_v52  ;;  %v1984_v62 = vsub.f32 %v73_v43, %v1970_v53  ;;  %v76_v63 = vsel %vm32_vm0, %v28_v50, 0  ;;  %1665 = vmatprep.subr.mxu0 %v1824_v23  ;;  %v261_v1 = vsub.f32 %v1948_v42, %v260_v17 }
  0x19   :  { %1592 = vmatmul.mubr.f32.gmra.mxu1 %v1842_v30  ;;  %v1989_v0 = vand.u32 4294901760, %v76_v63  ;;  %1693 = vmatprep.subr.mxu1 %v1780_v3  ;;  %v79_v2 = vsel %vm32_vm0, %v29_v57, 0  ;;  %v242_v5 = vand.u32 4294901760, %v241_v55  ;;  %v252_v40 = vand.u32 4294901760, %v251_v56 }
  0x1a   :  { %1594 = vmatprep.mubr.f32.mxu1 %v1893_v59  ;;  %v280_v12 = vand.u32 4294901760, %v1984_v62  ;;  %v2001_v22 = vand.u32 4294901760, %v79_v2  ;;  %v271_v43 = vsub.f32 %v1959_v49, %v270_v60  ;;  %v262_v51 = vand.u32 4294901760, %v261_v1 }
  0x1b   :  { %1567 = vmatmul.mubr.f32.gmra.mxu0 %v222_v54  ;;  %v1999_v13 = vsub.f32 %v76_v63, %v1989_v0 }
  0x1c   :  { %1569 = vmatprep.mubr.f32.mxu0 %v232_v58  ;;  %v2009_v50 = vsub.f32 %v79_v2, %v2001_v22  ;;  %v281_v52 = vsub.f32 %v1984_v62, %v280_v12  ;;  %v272_v55 = vand.u32 4294901760, %v271_v43 }
  0x1d   :  { %1595 = vmatmul.mubr.f32.gmra.mxu1 %v1898_v61  ;;  %v290_v44 = vand.u32 4294901760, %v1999_v13 }
  0x1e   :  { %1597 = vmatprep.mubr.f32.mxu1 %v1909_v7  ;;  %v300_v54 = vand.u32 4294901760, %v2009_v50  ;;  %v282_v57 = vand.u32 4294901760, %v281_v52 }
  0x1f   :  { %1570 = vmatmul.mubr.f32.gmra.mxu0 %v242_v5  ;;  %v291_v56 = vsub.f32 %v1999_v13, %v290_v44 }
  0x20   :  { %1572 = vmatprep.mubr.f32.mxu0 %v252_v40  ;;  %v301_v58 = vsub.f32 %v2009_v50, %v300_v54 }
  0x21   :  { %1598 = vmatmul.mubr.f32.gmra.mxu1 %v1916_v10  ;;  %v292_v63 = vand.u32 4294901760, %v291_v56 }
  0x22   :  { %1600 = vmatprep.mubr.f32.mxu1 %v1918_v11  ;;  %v302_v1 = vand.u32 4294901760, %v301_v58 }
  0x23   :  { %1573 = vmatmul.mubr.f32.gmra.mxu0 %v262_v51 }
  0x24   :  { %1575 = vmatprep.mubr.f32.mxu0 %v272_v55 }
  0x25   :  { %1601 = vmatmul.mubr.f32.gmra.mxu1 %v1929_v21 }
  0x26   :  { %1603 = vmatprep.mubr.f32.mxu1 %v1940_v39 }
  0x27   :  { %1576 = vmatmul.mubr.f32.gmra.mxu0 %v282_v57 }
  0x28   :  { %1578 = vmatprep.mubr.f32.mxu0 %v292_v63 }
  0x29   :  { %1604 = vmatmul.mubr.f32.gmra.mxu1 %v1970_v53 }
  0x2a   :  { %1606 = vmatprep.mubr.f32.mxu1 %v1989_v0 }
  0x2b   :  { %1579 = vmatmul.mubr.f32.gmra.mxu0 %v302_v1 }
  0x2c   :  { %1613 = vmatprep.mubr.f32.mxu0 %v1816_v19 }
  0x2d   :  { %1607 = vmatmul.mubr.f32.gmra.mxu1 %v2001_v22 }
  0x2e   :  { %1641 = vmatprep.mubr.f32.mxu1 %v150_v27 }
  0x2f   :  { %1614 = vmatmul.mubr.f32.vlgmr.msra.gmra.mxu0 %v1827_v24 }
  0x30   :  { %1666 = vmatpush3.msra.mxu0 %v1824_v23  ;;  %1616 = vmatprep.mubr.f32.mxu0 %v1833_v26 }
  0x31   :  { %1642 = vmatmul.mubr.f32.vlgmr.msra.gmra.mxu1 %v160_v32  ;;  %1667 = vmatprep.subr.mxu0 %v1830_v25 }
  0x32   :  { %1694 = vmatpush3.msra.mxu1 %v1780_v3  ;;  %1644 = vmatprep.mubr.f32.mxu1 %v170_v34 }
  0x33   :  { %1617 = vmatmul.mubr.f32.gmra.mxu0 %v1838_v28  ;;  %1695 = vmatprep.subr.mxu1 %v1782_v4 }
  0x34   :  { %1619 = vmatprep.mubr.f32.mxu0 %v1854_v37  ;;  %1668 = vmatpush3.msra.mxu0 %v1830_v25 }
  0x35   :  { %1645 = vmatmul.mubr.f32.gmra.mxu1 %v180_v36 }
  0x36   :  { %1647 = vmatprep.mubr.f32.mxu1 %v190_v47  ;;  %1696 = vmatpush3.msra.mxu1 %v1782_v4 }
  0x37   :  { %1620 = vmatmul.mubr.f32.gmra.mxu0 %v1857_v38 }
  0x38   :  { %1622 = vmatprep.mubr.f32.mxu0 %v1907_v6 }
  0x39   :  { %1648 = vmatmul.mubr.f32.gmra.mxu1 %v200_v48 }
  0x3a   :  { %1650 = vmatprep.mubr.f32.mxu1 %v210_v14 }
  0x3b   :  { %1623 = vmatmul.mubr.f32.gmra.mxu0 %v1914_v8 }
  0x3c   :  { %1625 = vmatprep.mubr.f32.mxu0 %v1927_v15 }
  0x3d   :  { %1651 = vmatmul.mubr.f32.gmra.mxu1 %v220_v31 }
  0x3e   :  { %1653 = vmatprep.mubr.f32.mxu1 %v230_v41 }
  0x3f   :  { %1626 = vmatmul.mubr.f32.gmra.mxu0 %v1935_v33 }
  0x40   :  { %1628 = vmatprep.mubr.f32.mxu0 %v1938_v35 }
  0x41   :  { %1654 = vmatmul.mubr.f32.gmra.mxu1 %v240_v45 }
  0x42   :  { %1656 = vmatprep.mubr.f32.mxu1 %v250_v46 }
  0x43   :  { %1629 = vmatmul.mubr.f32.gmra.mxu0 %v1948_v42 }
  0x44   :  { %1631 = vmatprep.mubr.f32.mxu0 %v1959_v49 }
  0x45   :  { %1657 = vmatmul.mubr.f32.gmra.mxu1 %v260_v17 }
  0x46   :  { %1659 = vmatprep.mubr.f32.mxu1 %v270_v60 }
  0x47   :  { %1632 = vmatmul.mubr.f32.gmra.mxu0 %v1984_v62 }
  0x48   :  { %1634 = vmatprep.mubr.f32.mxu0 %v1999_v13 }
  0x49   :  { %1660 = vmatmul.mubr.f32.gmra.mxu1 %v280_v12 }
  0x4a   :  { %1662 = vmatprep.mubr.f32.mxu1 %v290_v44 }
  0x4b   :  { %1635 = vmatmul.mubr.f32.gmra.mxu0 %v2009_v50 }
  0x4c   :  { %1669 = vmatprep.mubr.f32.mxu0 %v1794_v9 }
  0x4d   :  { %1663 = vmatmul.mubr.f32.gmra.mxu1 %v300_v54 }
  0x4e   :  { %1697 = vmatprep.mubr.f32.mxu1 %v1794_v9 }
  0x4f   :  { %1670 = vmatmul.mubr.f32.vlgmr.msra.gmra.mxu0 %v1807_v16 }
  0x50   :  { %1672 = vmatprep.mubr.f32.mxu0 %v1812_v18 }
  0x51   :  { %1698 = vmatmul.mubr.f32.vlgmr.msra.gmra.mxu1 %v1807_v16 }
  0x52   :  { %1700 = vmatprep.mubr.f32.mxu1 %v1812_v18 }
  0x53   :  { %1673 = vmatmul.mubr.f32.gmra.mxu0 %v1819_v20 }
  0x54   :  { %1675 = vmatprep.mubr.f32.mxu0 %v1840_v29 }
  0x55   :  { %1701 = vmatmul.mubr.f32.gmra.mxu1 %v1819_v20 }
  0x56   :  { %1703 = vmatprep.mubr.f32.mxu1 %v1840_v29 }
  0x57   :  { %1676 = vmatmul.mubr.f32.gmra.mxu0 %v1842_v30 }
  0x58   :  { %1678 = vmatprep.mubr.f32.mxu0 %v1893_v59 }
  0x59   :  { %1704 = vmatmul.mubr.f32.gmra.mxu1 %v1842_v30 }
  0x5a   :  { %1706 = vmatprep.mubr.f32.mxu1 %v1893_v59 }
  0x5b   :  { %1679 = vmatmul.mubr.f32.gmra.mxu0 %v1898_v61 }
  0x5c   :  { %1681 = vmatprep.mubr.f32.mxu0 %v1909_v7 }
  0x5d   :  { %1707 = vmatmul.mubr.f32.gmra.mxu1 %v1898_v61 }
  0x5e   :  { %1709 = vmatprep.mubr.f32.mxu1 %v1909_v7 }
  0x5f   :  { %1682 = vmatmul.mubr.f32.gmra.mxu0 %v1916_v10 }
  0x60   :  { %1684 = vmatprep.mubr.f32.mxu0 %v1918_v11 }
  0x61   :  { %1710 = vmatmul.mubr.f32.gmra.mxu1 %v1916_v10 }
  0x62   :  { %1712 = vmatprep.mubr.f32.mxu1 %v1918_v11 }
  0x63   :  { %1685 = vmatmul.mubr.f32.gmra.mxu0 %v1929_v21 }
  0x64   :  { %1687 = vmatprep.mubr.f32.mxu0 %v1940_v39 }
  0x65   :  { %1713 = vmatmul.mubr.f32.gmra.mxu1 %v1929_v21 }
  0x66   :  { %1715 = vmatprep.mubr.f32.mxu1 %v1940_v39 }
  0x67   :  { %1688 = vmatmul.mubr.f32.gmra.mxu0 %v1970_v53 }
  0x68   :  { %1690 = vmatprep.mubr.f32.mxu0 %v1989_v0 }
  0x69   :  { %1716 = vmatmul.mubr.f32.gmra.mxu1 %v1970_v53 }
  0x6a   :  { %1718 = vmatprep.mubr.f32.mxu1 %v1989_v0 }
  0x6b   :  { %1691 = vmatmul.mubr.f32.gmra.mxu0 %v2001_v22 }
  0x6d   :  { %1719 = vmatmul.mubr.f32.gmra.mxu1 %v2001_v22 }
  0xcf   :  { %v1559_v3 = vpop.f32.mrf.mxu0 }
  0xd1   :  { %v154_v4 = vpop.f32.mrf.mxu0  ;;  %v1587_v9 = vpop.f32.mrf.mxu1 }
  0xd2   :  { %v392_v54 = vadd.f32 %v1587_v9, %v1559_v3 }
  0xd3   :  { %v1562_v16 = vpop.f32.mrf.mxu0  ;;  %v385_v18 = vpop.f32.mrf.mxu1 }
  0xd4   :  { %v386_v57 = vadd.f32 %v385_v18, %v154_v4 }
  0xd5   :  { %v2107_v19 = vpop.f32.mrf.mxu0  ;;  %v1590_v20 = vpop.f32.mrf.mxu1 }
  0xd7   :  { %v2109_v23 = vpop.f32.mrf.mxu0  ;;  %v397_v24 = vpop.f32.mrf.mxu1 }
  0xd9   :  { %v2111_v25 = vpop.f32.mrf.mxu0  ;;  %v1593_v26 = vpop.f32.mrf.mxu1 }
  0xda   :  { %v416_v9 = vadd.f32 %v1593_v26, %v2109_v23 }
  0xdb   :  { %v2113_v27 = vpop.f32.mrf.mxu0  ;;  %v2115_v28 = vpop.f32.mrf.mxu1 }
  0xdd   :  { %v2117_v29 = vpop.f32.mrf.mxu0  ;;  %v2119_v30 = vpop.f32.mrf.mxu1 }
  0xde   :  { %v428_v23 = vadd.f32 %v2119_v30, %v2113_v27 }
  0xdf   :  { %v2121_v32 = vpop.f32.mrf.mxu0  ;;  %v2123_v34 = vpop.f32.mrf.mxu1 }
  0xe1   :  { %v2125_v36 = vpop.f32.mrf.mxu0  ;;  %v2127_v37 = vpop.f32.mrf.mxu1 }
  0xe3   :  { %v2129_v38 = vpop.f32.mrf.mxu0  ;;  %v2131_v47 = vpop.f32.mrf.mxu1 }
  0xe5   :  { %v2133_v48 = vpop.f32.mrf.mxu0  ;;  %v2135_v59 = vpop.f32.mrf.mxu1 }
  0xe7   :  { %v2137_v61 = vpop.f32.mrf.mxu0  ;;  %v2139_v6 = vpop.f32.mrf.mxu1 }
  0xe9   :  { %v2141_v7 = vpop.f32.mrf.mxu0  ;;  %v2143_v8 = vpop.f32.mrf.mxu1 }
  0xeb   :  { %v2145_v10 = vpop.f32.mrf.mxu0  ;;  %v2147_v11 = vpop.f32.mrf.mxu1 }
  0xec   :  { %2320 = vst [vmem:[#allocation5_spill] sm:$0xff] %v2145_v10 }
  0xed   :  { %v2149_v14 = vpop.f32.mrf.mxu0  ;;  %v2151_v15 = vpop.f32.mrf.mxu1 }
  0xee   :  { %2321 = vst [vmem:[#allocation6_spill] sm:$0xff] %v2149_v14  ;;  %2322 = vst [vmem:[#allocation7_spill] sm:$0xff] %v2151_v15 }
  0xef   :  { %v2153_v21 = vpop.f32.mrf.mxu1  ;;  %v1615_v31 = vpop.f32.mrf.mxu0 }
  0xf0   :  { %2323 = vst [vmem:[#allocation8_spill] sm:$0xff] %v2153_v21  ;;  %v559_v58 = vadd.f32 %v1615_v31, %v392_v54  ;;  %v404_v21 = vadd.f32 %v1590_v20, %v1562_v16  ;;  %v410_v16 = vadd.f32 %v2115_v28, %v2111_v25  ;;  %v422_v25 = vadd.f32 %v2123_v34, %v2117_v29 }
  0xf1   :  { %v551_v33 = vpop.f32.mrf.mxu0  ;;  %v1643_v35 = vpop.f32.mrf.mxu1  ;;  %v434_v29 = vadd.f32 %v2131_v47, %v2125_v36 }
  0xf2   :  { %v552_v14 = vadd.f32 %v551_v33, %v386_v57 }
  0xf3   :  { %v1618_v39 = vpop.f32.mrf.mxu0  ;;  %v731_v41 = vpop.f32.mrf.mxu1 }
  0xf4   :  { %v573_v3 = vadd.f32 %v1618_v39, %v404_v21  ;;  %v732_v18 = vadd.f32 %v731_v41, %v552_v14 }
  0xf5   :  { %v565_v42 = vpop.f32.mrf.mxu0  ;;  %v1646_v45 = vpop.f32.mrf.mxu1 }
  0xf7   :  { %v1621_v46 = vpop.f32.mrf.mxu0  ;;  %v747_v49 = vpop.f32.mrf.mxu1 }
  0xf8   :  { %v587_v20 = vadd.f32 %v1621_v46, %v416_v9 }
  0xf9   :  { %v579_v17 = vpop.f32.mrf.mxu0  ;;  %v1649_v53 = vpop.f32.mrf.mxu1 }
  0xfa   :  { %v772_v28 = vadd.f32 %v1649_v53, %v587_v20 }
  0xfb   :  { %v1624_v60 = vpop.f32.mrf.mxu0  ;;  %v763_v62 = vpop.f32.mrf.mxu1 }
  0xfd   :  { %v593_v0 = vpop.f32.mrf.mxu0  ;;  %v2155_v2 = vpop.f32.mrf.mxu1 }
  0xff   :  { %v2157_v5 = vpop.f32.mrf.mxu0  ;;  %v2159_v12 = vpop.f32.mrf.mxu1 }
 0x101   :  { %v2161_v13 = vpop.f32.mrf.mxu0  ;;  %v2163_v22 = vpop.f32.mrf.mxu1 }
 0x103   :  { %v2165_v40 = vpop.f32.mrf.mxu0  ;;  %v2167_v43 = vpop.f32.mrf.mxu1 }
 0x105   :  { %v2169_v44 = vpop.f32.mrf.mxu0  ;;  %v2171_v50 = vpop.f32.mrf.mxu1 }
 0x107   :  { %v2173_v51 = vpop.f32.mrf.mxu0  ;;  %v2175_v52 = vpop.f32.mrf.mxu1 }
 0x108   :  { %2324 = vst [vmem:[#allocation9_spill] sm:$0xff] %v2173_v51  ;;  %2325 = vst [vmem:[#allocation10_spill] sm:$0xff] %v2175_v52  ;;  %v398_v51 = vadd.f32 %v397_v24, %v2107_v19  ;;  %v740_v52 = vadd.f32 %v1643_v35, %v559_v58  ;;  %v580_v19 = vadd.f32 %v579_v17, %v410_v16 }
 0x109   :  { %v2177_v55 = vpop.f32.mrf.mxu0  ;;  %v2179_v56 = vpop.f32.mrf.mxu1  ;;  %v608_v58 = vadd.f32 %v2161_v13, %v434_v29 }
 0x10a   :  { %2326 = vst [vmem:[#allocation11_spill] sm:$0xff] %v2177_v55  ;;  %v566_v31 = vadd.f32 %v565_v42, %v398_v51  ;;  %v601_v42 = vadd.f32 %v1624_v60, %v428_v23  ;;  %v440_v51 = vadd.f32 %v2127_v37, %v2121_v32  ;;  %v764_v27 = vadd.f32 %v763_v62, %v580_v19  ;;  %v2332_v23 = vld [vmem:[#allocation7_spill] sm:$0xff] }
 0x10b   :  { %v2181_v63 = vpop.f32.mrf.mxu0  ;;  %v2183_v1 = vpop.f32.mrf.mxu1 }
 0x10c   :  { %2327 = vst [vmem:[#allocation12_spill] sm:$0xff] %v2183_v1  ;;  %v748_v26 = vadd.f32 %v747_v49, %v566_v31  ;;  %v788_v60 = vadd.f32 %v2155_v2, %v601_v42  ;;  %v615_v32 = vadd.f32 %v2157_v5, %v440_v51  ;;  %v446_v2 = vadd.f32 %v2139_v6, %v2133_v48 }
 0x10d   :  { %v2185_v15 = vpop.f32.mrf.mxu0  ;;  %v2187_v10 = vpop.f32.mrf.mxu1 }
 0x10e   :  { %2328 = vst [vmem:[#allocation13_spill] sm:$0xff] %v2185_v15  ;;  %2329 = vst [vmem:[#allocation14_spill] sm:$0xff] %v2187_v10  ;;  %v756_v15 = vadd.f32 %v1646_v45, %v573_v3  ;;  %v804_v31 = vadd.f32 %v2163_v22, %v615_v32  ;;  %v458_v22 = vadd.f32 %v2147_v11, %v2141_v7 }
 0x10f   :  { %v2191_v55 = vpop.f32.mrf.mxu1  ;;  %v1671_v4 = vpop.f32.mrf.mxu0 }
 0x110   :  { %v935_v54 = vadd.f32 %v1671_v4, %v740_v52 }
 0x111   :  { %v928_v33 = vpop.f32.mrf.mxu0  ;;  %v1699_v57 = vpop.f32.mrf.mxu1 }
 0x112   :  { %v929_v10 = vadd.f32 %v928_v33, %v732_v18  ;;  %v1098_v1 = vadd.f32 %v1699_v57, %v935_v54  ;;  %v796_v54 = vadd.f32 %v2167_v43, %v608_v58  ;;  %v622_v33 = vadd.f32 %v2169_v44, %v446_v2  ;;  %v2331_v44 = vld [vmem:[#allocation5_spill] sm:$0xff] }
 0x113   :  { %v1674_v24 = vpop.f32.mrf.mxu0  ;;  %v1091_v21 = vpop.f32.mrf.mxu1 }
 0x114   :  { %v947_v35 = vadd.f32 %v1674_v24, %v756_v15  ;;  %v1092_v14 = vadd.f32 %v1091_v21, %v929_v10  ;;  %1283 = vrot.lane.b32.xlu0 %v1098_v1, %s1747_s0  ;;  %v594_v10 = vadd.f32 %v593_v0, %v422_v25  ;;  %v452_v0 = vadd.f32 %v2135_v59, %v2129_v38 }
 0x115   :  { %v940_v39 = vpop.f32.mrf.mxu0  ;;  %v1702_v41 = vpop.f32.mrf.mxu1  ;;  %v2339_v58 = vld [vmem:[#allocation14_spill] sm:$0xff] }
 0x116   :  { %v1401_v45 = vpack.c.bf16 %v1098_v1, %v1092_v14  ;;  %v941_v46 = vadd.f32 %v940_v39, %v748_v26  ;;  %v1110_v17 = vadd.f32 %v1702_v41, %v947_v35  ;;  %v780_v9 = vadd.f32 %v2159_v12, %v594_v10  ;;  %v2333_v35 = vld [vmem:[#allocation11_spill] sm:$0xff]  ;;  %v2334_v39 = vld [vmem:[#allocation10_spill] sm:$0xff] }
 0x117   :  { %v1677_v30 = vpop.f32.mrf.mxu0  ;;  %v1103_v15 = vpop.f32.mrf.mxu1  ;;  %v629_v38 = vadd.f32 %v2165_v40, %v452_v0  ;;  %v464_v12 = vadd.f32 %v2143_v8, %v2137_v61  ;;  %v2330_v61 = vld [vmem:[#allocation9_spill] sm:$0xff]  ;;  %v476_v26 = vadd.f32 %v2332_v23, %v2331_v44  ;;  %v812_v41 = vadd.f32 %v2334_v39, %v622_v33 }
 0x118   :  { %1402 = vst [vmem:[#allocation2] sm:$0xff] %v1401_v45   ;;  %v959_v49 = vadd.f32 %v1677_v30, %v772_v28  ;;  %v1104_v52 = vadd.f32 %v1103_v15, %v941_v46  ;;  %1287 = vrot.lane.b32.xlu1 %v1110_v17, %s1747_s0  ;;  %1281 = vrot.lane.b32.xlu0 %v1092_v14, %s1747_s0  ;;  %v2336_v45 = vld [vmem:[#allocation8_spill] sm:$0xff] }
 0x119   :  { %v952_v34 = vpop.f32.mrf.mxu0  ;;  %v1705_v53 = vpop.f32.mrf.mxu1  ;;  %v820_v24 = vadd.f32 %v2171_v50, %v629_v38  ;;  %v643_v8 = vadd.f32 %v2330_v61, %v464_v12  ;;  %v636_v14 = vadd.f32 %v2333_v35, %v458_v22  ;;  %v2335_v50 = vld [vmem:[#allocation6_spill] sm:$0xff]  ;;  %v657_v30 = vadd.f32 %v2181_v63, %v476_v26 }
 0x11a   :  { %v1406_v37 = vpack.c.bf16 %v1110_v17, %v1104_v52  ;;  %v953_v62 = vadd.f32 %v952_v34, %v764_v27  ;;  %v1122_v4 = vadd.f32 %v1705_v53, %v959_v49  ;;  %v470_v46 = vadd.f32 %v2336_v45, %v2335_v50  ;;  %v2337_v49 = vld [vmem:[#allocation12_spill] sm:$0xff]  ;;  %v2338_v53 = vld [vmem:[#allocation13_spill] sm:$0xff] }
 0x11b   :  { %v1680_v1 = vpop.f32.mrf.mxu0  ;;  %v1115_v3 = vpop.f32.mrf.mxu1  ;;  %v836_v27 = vadd.f32 %v2179_v56, %v643_v8  ;;  %v852_v63 = vadd.f32 %v2339_v58, %v657_v30 }
 0x11c   :  { %1438 = vst [vmem:[#allocation2 + $0x8] sm:$0xff] %v1406_v37   ;;  %v971_v36 = vadd.f32 %v1680_v1, %v788_v60  ;;  %v1116_v47 = vadd.f32 %v1115_v3, %v953_v62  ;;  %1285 = vrot.lane.b32.xlu1 %v1104_v52, %s1747_s0  ;;  %v828_v52 = vadd.f32 %v2337_v49, %v636_v14 }
 0x11d   :  { %v964_v5 = vpop.f32.mrf.mxu0  ;;  %v1708_v18 = vpop.f32.mrf.mxu1  ;;  %v650_v60 = vadd.f32 %v2338_v53, %v470_v46 }
 0x11e   :  { %v1411_v59 = vpack.c.bf16 %v1122_v4, %v1116_v47  ;;  %v965_v13 = vadd.f32 %v964_v5, %v780_v9  ;;  %1289 = vrot.lane.b32.xlu0 %v1116_v47, %s1747_s0  ;;  %v1134_v48 = vadd.f32 %v1708_v18, %v971_v36 }
 0x11f   :  { %v1683_v16 = vpop.f32.mrf.mxu0  ;;  %v1127_v20 = vpop.f32.mrf.mxu1  ;;  %v844_v36 = vadd.f32 %v2191_v55, %v650_v60 }
 0x120   :  { %1439 = vst [vmem:[#allocation2 + $0x10] sm:$0xff] %v1411_v59   ;;  %v983_v6 = vadd.f32 %v1683_v16, %v804_v31  ;;  %v1128_v57 = vadd.f32 %v1127_v20, %v965_v13  ;;  %1291 = vrot.lane.b32.xlu1 %v1122_v4, %s1747_s0 }
 0x121   :  { %v976_v40 = vpop.f32.mrf.mxu0  ;;  %v1711_v19 = vpop.f32.mrf.mxu1 }
 0x122   :  { %v1416_v43 = vpack.c.bf16 %v1134_v48, %v1128_v57  ;;  %v977_v21 = vadd.f32 %v976_v40, %v796_v54  ;;  %1293 = vrot.lane.b32.xlu0 %v1128_v57, %s1747_s0  ;;  %v1146_v7 = vadd.f32 %v1711_v19, %v983_v6 }
 0x123   :  { %v1686_v25 = vpop.f32.mrf.mxu0  ;;  %v1139_v28 = vpop.f32.mrf.mxu1 }
 0x124   :  { %1440 = vst [vmem:[#allocation2 + $0x18] sm:$0xff] %v1416_v43   ;;  %v995_v11 = vadd.f32 %v1686_v25, %v820_v24  ;;  %v1140_v42 = vadd.f32 %v1139_v28, %v977_v21  ;;  %1295 = vrot.lane.b32.xlu1 %v1134_v48, %s1747_s0 }
 0x125   :  { %v988_v17 = vpop.f32.mrf.mxu0  ;;  %v1714_v51 = vpop.f32.mrf.mxu1 }
 0x126   :  { %v1421_v15 = vpack.c.bf16 %v1146_v7, %v1140_v42  ;;  %v989_v10 = vadd.f32 %v988_v17, %v812_v41  ;;  %1297 = vrot.lane.b32.xlu0 %v1140_v42, %s1747_s0  ;;  %v1158_v32 = vadd.f32 %v1714_v51, %v995_v11 }
 0x127   :  { %v1689_v29 = vpop.f32.mrf.mxu0  ;;  %v1151_v34 = vpop.f32.mrf.mxu1 }
 0x128   :  { %1441 = vst [vmem:[#allocation2 + $0x20] sm:$0xff] %v1421_v15   ;;  %v1007_v37 = vadd.f32 %v1689_v29, %v836_v27  ;;  %v1152_v62 = vadd.f32 %v1151_v34, %v989_v10  ;;  %1299 = vrot.lane.b32.xlu1 %v1146_v7, %s1747_s0 }
 0x129   :  { %v1000_v0 = vpop.f32.mrf.mxu0  ;;  %v1717_v56 = vpop.f32.mrf.mxu1 }
 0x12a   :  { %v1426_v1 = vpack.c.bf16 %v1158_v32, %v1152_v62  ;;  %v1001_v3 = vadd.f32 %v1000_v0, %v828_v52  ;;  %1301 = vrot.lane.b32.xlu0 %v1152_v62, %s1747_s0  ;;  %v1170_v47 = vadd.f32 %v1717_v56, %v1007_v37 }
 0x12b   :  { %v1692_v9 = vpop.f32.mrf.mxu0  ;;  %v1163_v4 = vpop.f32.mrf.mxu1 }
 0x12c   :  { %1442 = vst [vmem:[#allocation2 + $0x28] sm:$0xff] %v1426_v1   ;;  %v1019_v2 = vadd.f32 %v1692_v9, %v852_v63  ;;  %v1164_v5 = vadd.f32 %v1163_v4, %v1001_v3  ;;  %1303 = vrot.lane.b32.xlu1 %v1158_v32, %s1747_s0 }
 0x12d   :  { %v1012_v18 = vpop.f32.mrf.mxu0  ;;  %v1720_v31 = vpop.f32.mrf.mxu1 }
 0x12e   :  { %v1431_v38 = vpack.c.bf16 %v1170_v47, %v1164_v5  ;;  %v1013_v59 = vadd.f32 %v1012_v18, %v844_v36  ;;  %1305 = vrot.lane.b32.xlu0 %v1164_v5, %s1747_s0  ;;  %v1182_v12 = vadd.f32 %v1720_v31, %v1019_v2 }
 0x12f   :  { %v1175_v13 = vpop.f32.mrf.mxu1 }
 0x130   :  { %1443 = vst [vmem:[#allocation2 + $0x30] sm:$0xff] %v1431_v38   ;;  %v1176_v54 = vadd.f32 %v1175_v13, %v1013_v59  ;;  %1307 = vrot.lane.b32.xlu1 %v1170_v47, %s1747_s0 }
 0x132   :  { %v1436_v55 = vpack.c.bf16 %v1182_v12, %v1176_v54  ;;  %1309 = vrot.lane.b32.xlu0 %v1176_v54, %s1747_s0 }
 0x134   :  { %1444 = vst [vmem:[#allocation2 + $0x38] sm:$0xff] %v1436_v55   ;;  %1311 = vrot.lane.b32.xlu1 %v1182_v12, %s1747_s0 }
 0x135   :  { %1736 = shalt.err (!%p1733_p4)
}
 0x136   :  { %s1749_s22 = smov 64   ;;  %s1750_s23 = smov 4   ;;  %vm1329_vm1 = vcmask 15360  }
 0x137   :  { %1357 = dma.vmem_to_hbm [thread:$0]  %s1352_s21, 1024, %s2318_s2, [#allocation3], %s1749_s22, %s1749_s22, %s1750_s23  }
 0x186   :  { %v1284_v16 = vpop.permute.xlu0 %1283 }
 0x187   :  { %1331 = vst.msk [vmem:[%s2319_s3 + $0x8] sm:$0xff] %vm1329_vm1, %v1284_v16 }
 0x18a   :  { %v1288_v20 = vpop.permute.xlu1 %1287  ;;  %v1282_v33 = vpop.permute.xlu0 %1281 }
 0x18b   :  { %1333 = vst.msk [vmem:[%s2319_s3 + $0x18] sm:$0xff] %vm1329_vm1, %v1288_v20  ;;  %1330 = vst.msk [vmem:[%s2319_s3] sm:$0xff] %vm1329_vm1, %v1282_v33 }
 0x18e   :  { %v1286_v48 = vpop.permute.xlu1 %1285 }
 0x18f   :  { %1332 = vst.msk [vmem:[%s2319_s3 + $0x10] sm:$0xff] %vm1329_vm1, %v1286_v48 }
 0x190   :  { %v1290_v6 = vpop.permute.xlu0 %1289 }
 0x191   :  { %1334 = vst.msk [vmem:[%s2319_s3 + $0x20] sm:$0xff] %vm1329_vm1, %v1290_v6 }
 0x192   :  { %v1292_v57 = vpop.permute.xlu1 %1291 }
 0x193   :  { %1335 = vst.msk [vmem:[%s2319_s3 + $0x28] sm:$0xff] %vm1329_vm1, %v1292_v57 }
 0x194   :  { %v1294_v22 = vpop.permute.xlu0 %1293 }
 0x195   :  { %1336 = vst.msk [vmem:[%s2319_s3 + $0x30] sm:$0xff] %vm1329_vm1, %v1294_v22 }
 0x196   :  { %v1296_v40 = vpop.permute.xlu1 %1295 }
 0x197   :  { %1337 = vst.msk [vmem:[%s2319_s3 + $0x38] sm:$0xff] %vm1329_vm1, %v1296_v40 }
 0x198   :  { %v1298_v19 = vpop.permute.xlu0 %1297 }
 0x199   :  { %1338 = vst.msk [vmem:[%s2319_s3 + $0x40] sm:$0xff] %vm1329_vm1, %v1298_v19 }
 0x19a   :  { %v1300_v24 = vpop.permute.xlu1 %1299 }
 0x19b   :  { %1339 = vst.msk [vmem:[%s2319_s3 + $0x48] sm:$0xff] %vm1329_vm1, %v1300_v24 }
 0x19c   :  { %v1302_v61 = vpop.permute.xlu0 %1301 }
 0x19d   :  { %1340 = vst.msk [vmem:[%s2319_s3 + $0x50] sm:$0xff] %vm1329_vm1, %v1302_v61 }
 0x19e   :  { %v1304_v8 = vpop.permute.xlu1 %1303 }
 0x19f   :  { %1341 = vst.msk [vmem:[%s2319_s3 + $0x58] sm:$0xff] %vm1329_vm1, %v1304_v8 }
 0x1a0   :  { %v1306_v43 = vpop.permute.xlu0 %1305 }
 0x1a1   :  { %1342 = vst.msk [vmem:[%s2319_s3 + $0x60] sm:$0xff] %vm1329_vm1, %v1306_v43 }
 0x1a2   :  { %v1308_v21 = vpop.permute.xlu1 %1307 }
 0x1a3   :  { %1343 = vst.msk [vmem:[%s2319_s3 + $0x68] sm:$0xff] %vm1329_vm1, %v1308_v21 }
 0x1a4   :  { %v1310_v44 = vpop.permute.xlu0 %1309 }
 0x1a5   :  { %1344 = vst.msk [vmem:[%s2319_s3 + $0x70] sm:$0xff] %vm1329_vm1, %v1310_v44 }
 0x1a6   :  { %v1312_v23 = vpop.permute.xlu1 %1311 }
 0x1a7   :  { %1345 = vst.msk [vmem:[%s2319_s3 + $0x78] sm:$0xff] %vm1329_vm1, %v1312_v23 }
 0x1a8   :  { %1745 = dma.done.wait [#allocation3], 1024  }
 0x1a9   :  { %1746 = vsyncadd [#allocation3], 4294966272 }
 0x1aa   :  { %1365 = vsyncpa [#allocation3], 1 }

</bundles_post_ra>
